<compile_context>
chip_gen: v7x
topology: tpu7x:2x2x1
jax: 0.10.0
libtpu: 0.0.40
codegen_flags: <defaults>
</compile_context>

<pallas_src>
import math

import jax
import jax.numpy as jnp
from jax.experimental import pallas as pl
from jax.experimental.pallas import tpu as pltpu


def pe_add_kernel(x_ref, pe_ref, o_ref):
    # x_ref / o_ref: (TB, TN)   pe_ref: (1, TN)  -- 2-D broadcast add on the VPU.
    o_ref[...] = x_ref[...] + pe_ref[...]


def make_pe(max_len: int, d_model: int, dtype=jnp.float32):
    """(max_len, d_model) sin/cos table, identical to the PyTorch __init__ layout."""
    assert d_model % 2 == 0, "d_model must be even (same assumption as the PyTorch module)"
    position = jnp.arange(max_len, dtype=jnp.float32)[:, None]                 # (L, 1)
    term = jnp.exp(
        jnp.arange(0, d_model, 2, dtype=jnp.float32) * (-math.log(10000.0) / d_model)
    )                                                                          # (D/2,)
    ang = position * term                                                      # (L, D/2)
    # interleave: even cols = sin, odd cols = cos
    pe = jnp.stack([jnp.sin(ang), jnp.cos(ang)], axis=-1).reshape(max_len, d_model)
    return pe.astype(dtype)


def _pick_tiles(nrows: int, ncols: int, itemsize: int, tile_budget_bytes: int = 2 << 20):
    """Largest lane-dense tile whose x-block stays within `tile_budget_bytes`."""
    # Row (batch) tile: full extent when small (always a legal block), else multiple of 8.
    if nrows <= 8:
        tb = nrows
    else:
        tb = min((nrows // 8) * 8, 256)
    # Column tile: multiple of 128 (unmasked stores) unless the array is narrower.
    if ncols < 128:
        tn = ncols  # full extent -> legal block, lane-sparse only for tiny inputs
    else:
        budget_cols = max((tile_budget_bytes // (itemsize * tb)) // 128 * 128, 128)
        tn = min(((ncols + 127) // 128) * 128, budget_cols)
    return tb, tn


def positional_encoding(x, pe):
    """x: (B, S, D); pe: (max_len, D).  Returns x + pe[:S] (eval-mode dropout = identity)."""
    B, S, D = x.shape
    max_len, d_model = pe.shape
    assert d_model == D, "pe d_model mismatch"
    assert S <= max_len, "sequence longer than max_len"
    if pe.dtype != x.dtype:  # build pe in x.dtype at init to avoid this cast entirely
        pe = pe.astype(x.dtype)

    ncols = S * D
    x2 = x.reshape(B, ncols)  # metadata-only (row-major contiguous)

    itemsize = jnp.dtype(x.dtype).itemsize
    tb, tn = _pick_tiles(B, ncols, itemsize)

    if tn % 128 == 0:
        # Lane-dense path: the flattened full table's first S*D columns are exactly
        # pe[:S] flattened, so no wrapper-side slice/copy is needed.
        pe_flat = pe.reshape(1, max_len * D)
    else:
        # Tiny-input path (S*D < 128): block must span the full last dim of pe.
        pe_flat = pe[:S].reshape(1, ncols)

    n_col = pl.cdiv(ncols, tn)
    n_row = pl.cdiv(B, tb)

    out2 = pl.pallas_call(
        pe_add_kernel,
        out_shape=jax.ShapeDtypeStruct((B, ncols), x.dtype),
        grid=(n_col, n_row),  # row/batch axis innermost -> pe column block stays resident
        in_specs=[
            pl.BlockSpec((tb, tn), lambda j, i: (i, j)),   # x tile
            pl.BlockSpec((1, tn), lambda j, i: (0, j)),    # pe tile (constant across rows)
        ],
        out_specs=pl.BlockSpec((tb, tn), lambda j, i: (i, j)),
        compiler_params=pltpu.CompilerParams(
            dimension_semantics=("parallel", "parallel"),
        ),
    )(x2, pe_flat)

    return out2.reshape(B, S, D)


if __name__ == "__main__":
    B, S, D = 2, 8, 32
    MAX_LEN = 64
    DROPOUT_P = 0.1  # unused at eval time (identity), kept for parity with __init__

    key = jax.random.PRNGKey(0)
    x = jax.random.normal(key, (B, S, D), dtype=jnp.float32)

    pe = make_pe(MAX_LEN, D, dtype=x.dtype)

    out = positional_encoding(x, pe)
    out = jax.block_until_ready(out)

    # Pure-JAX reference of the PyTorch forward (eval mode)
    ref = x + pe[None, :S, :]
    assert out.shape == (B, S, D)
    assert jnp.allclose(out, ref, atol=1e-6, rtol=1e-6), "mismatch vs reference"

    print("KERNEL_OK")
</pallas_src>

<mosaic_0001>
module attributes {stable_mosaic.version = 11 : i64} {
  func.func @pe_add_kernel(%arg0: i32, %arg1: i32, %arg2: memref<2x256xf32, #tpu.memory_space<vmem>>, %arg3: memref<1x256xf32, #tpu.memory_space<vmem>>, %arg4: memref<2x256xf32, #tpu.memory_space<vmem>>) attributes {dimension_semantics = [#tpu.dimension_semantics<parallel>, #tpu.dimension_semantics<parallel>], iteration_bounds = array<i64: 1, 1>, scalar_prefetch = 0 : i64, scratch_operands = 0 : i64, tpu.core_type = #tpu.core_type<tc>, window_params = [{transform_indices = @transform_0, window_bounds = array<i64: 2, 256>}, {transform_indices = @transform_1, window_bounds = array<i64: 1, 256>}, {transform_indices = @transform_2, window_bounds = array<i64: 2, 256>}]} {
    %c0 = arith.constant 0 : index
    %c0_0 = arith.constant 0 : index
    %0 = vector.load %arg2[%c0, %c0_0] : memref<2x256xf32, #tpu.memory_space<vmem>>, vector<2x256xf32>
    %c0_1 = arith.constant 0 : index
    %c0_2 = arith.constant 0 : index
    %1 = vector.load %arg3[%c0_1, %c0_2] : memref<1x256xf32, #tpu.memory_space<vmem>>, vector<1x256xf32>
    %2 = vector.broadcast %1 : vector<1x256xf32> to vector<2x256xf32>
    %3 = arith.addf %0, %2 : vector<2x256xf32>
    %c0_3 = arith.constant 0 : index
    %c0_4 = arith.constant 0 : index
    %4 = vector.load %arg4[%c0_3, %c0_4] : memref<2x256xf32, #tpu.memory_space<vmem>>, vector<2x256xf32>
    tpu.vector_store %arg4[%c0_3, %c0_4], %3 {strides = array<i32>} : memref<2x256xf32, #tpu.memory_space<vmem>>, vector<2x256xf32>,
    return
  }
  func.func @transform_0(%arg0: i32, %arg1: i32) -> (i32, i32) {
    %c0_i32 = arith.constant 0 : i32
    return %arg1, %arg0 : i32, i32
  }
  func.func @transform_1(%arg0: i32, %arg1: i32) -> (i32, i32) {
    %c0_i32 = arith.constant 0 : i32
    %c0_i32_0 = arith.constant 0 : i32
    return %c0_i32, %arg0 : i32, i32
  }
  func.func @transform_2(%arg0: i32, %arg1: i32) -> (i32, i32) {
    %c0_i32 = arith.constant 0 : i32
    return %arg1, %arg0 : i32, i32
  }
}

</mosaic_0001>

<bundles_post_ra>
// kernel: tpu_custom_call.1
= control target key start
LH: loop header
LB: loop body
LE: loop exit
PB: predicated region body
PF: predicated region fallthrough
CT: control target
= control target key end

     0   :  { %7 = vsyncpa [#allocation3], 0  ;;  %s215_s0 = inlined_call_operand.hbm [shape: f32[2,256], index: 0, kind: input, shape index: {}]   ;;  %s216_s1 = inlined_call_operand.hbm [shape: f32[1,2048], index: 1, kind: input, shape index: {}]   ;;  %s217_s2 = inlined_call_operand.hbm [shape: f32[2,256], index: 2, kind: output, shape index: {}]  }
   0x1   :  { %8 = vsyncpa [#allocation6], 0 }
   0x2   :  { %9 = vsyncpa [#allocation4], 0  ;;  %s150_s9 = smov [#allocation2]   ;;  %s151_s11 = smov [#allocation5]  }
   0x3   :  { %s16_s10 = sshll.u32 %s150_s9, 4  ;;  %s26_s12 = sshll.u32 %s151_s11, 4  ;;  %s17_s10 = int_to_ptr.vmem [resolvable:$true] %s16_s10  ;;  %s169_s12 = int_to_ptr.vmem [resolvable:$true] %s26_s12 }
   0x4   :  { %s78_s15 = scalar_lea.hbm %s215_s0, 64 }
   0x5   :  { %p79_p0 = scmp.ne.s32.totalorder %s215_s0, %s78_s15  ;;  %p82_p1 = scmp.lt.u32.totalorder %s78_s15, %s215_s0 }
   0x7   :  { %p84_p2 = pnand %p82_p1, %p79_p0 }
   0x9   :  { %87 = shalt.err (!%p84_p2)
}
   0xa   :  { %s88_s20 = scalar_lea.vmem %s17_s10, 64  ;;  %p93_p4 = scmp.lt.s32.totalorder %s17_s10, %s17_s10 }
   0xb   :  { %p89_p3 = scmp.ne.s32.totalorder %s17_s10, %s88_s20  ;;  %p94_p5 = scmp.lt.s32.totalorder %s88_s20, %s88_s20 }
   0xd   :  { %p95_p6 = por %p94_p5, %p93_p4 }
   0xf   :  { %p96_p7 = pnand %p95_p6, %p89_p3 }
  0x11   :  { %99 = shalt.err (!%p96_p7)
}
  0x12   :  { %19 = dma.hbm_to_vmem [thread:$0]  %s215_s0, 64, %s17_s10, [#allocation3]  }
  0x13   :  { %s100_s25 = scalar_lea.hbm %s216_s1, 32  ;;  %s102_s30 = scalar_lea.hbm %s216_s1, 256 }
  0x14   :  { %p101_p8 = scmp.ne.s32.totalorder %s216_s1, %s100_s25  ;;  %p103_p9 = scmp.lt.u32.totalorder %s102_s30, %s100_s25 }
  0x15   :  { %p104_p10 = scmp.lt.u32.totalorder %s100_s25, %s216_s1 }
  0x17   :  { %p105_p11 = por %p104_p10, %p103_p9 }
  0x19   :  { %p106_p12 = pnand %p105_p11, %p101_p8 }
  0x1b   :  { %109 = shalt.err (!%p106_p12)
}
  0x1c   :  { %s110_s0 = scalar_lea.vmem %s169_s12, 32  ;;  %p115_p0 = scmp.lt.s32.totalorder %s169_s12, %s169_s12 }
  0x1d   :  { %p111_p13 = scmp.ne.s32.totalorder %s169_s12, %s110_s0  ;;  %p116_p1 = scmp.lt.s32.totalorder %s110_s0, %s110_s0 }
  0x1f   :  { %p117_p2 = por %p116_p1, %p115_p0 }
  0x21   :  { %p118_p3 = pnand %p117_p2, %p111_p13 }
  0x23   :  { %121 = shalt.err (!%p118_p3)
}
  0x24   :  { %29 = dma.hbm_to_vmem [thread:$0]  %s216_s1, 32, %s169_s12, [#allocation6]  }
  0x25   :  { %144 = dma.done.wait [#allocation3], 64  }
  0x26   :  { %145 = vsyncadd [#allocation3], 4294967232 }
  0x27   :  { %146 = dma.done.wait [#allocation6], 32  }
  0x28   :  { %147 = vsyncadd [#allocation6], 4294967264  ;;  %v39_v0 = vlaneseq  ;;  %v152_v1 = vmov 1983009808   ;;  %v37_v7 = vld [vmem:[#allocation5] sm:$0x3] }
  0x29   :  { %v49_v2 = vunpack.c.l.s4 %v152_v1  ;;  %v36_v12 = vld [vmem:[#allocation2] sm:$0xf]  ;;  %s153_s7 = smov [#allocation7]  }
  0x2a   :  { %v40_v3 = vshrl.u32 %v39_v0, 7  ;;  %s64_s8 = sshll.u32 %s153_s7, 4  ;;  %s65_s8 = int_to_ptr.vmem [resolvable:$true] %s64_s8 }
  0x2b   :  { %v50_v6 = vunpack.c.0.s8 %v49_v2  ;;  %s122_s1 = scalar_lea.vmem %s65_s8, 64  ;;  %p127_p5 = scmp.lt.s32.totalorder %s65_s8, %s65_s8 }
  0x2c   :  { %v41_v4 = vsub.s32 0, %v40_v3  ;;  %v45_v5 = vsub.s32 1, %v40_v3  ;;  %p123_p4 = scmp.ne.s32.totalorder %s65_s8, %s122_s1  ;;  %p128_p6 = scmp.lt.s32.totalorder %s122_s1, %s122_s1 }
  0x2d   :  { %v53_v10 = vsub.s32 %v50_v6, %v40_v3 }
  0x2e   :  { %v42_v8 = vrot.slane %v37_v7, %v41_v4  ;;  %v46_v9 = vrot.slane %v37_v7, %v45_v5  ;;  %p129_p7 = por %p128_p6, %p127_p5 }
  0x30   :  { %v47_v11 = vcombine.low %v42_v8, %v46_v9  ;;  %p130_p8 = pnand %p129_p7, %p123_p4 }
  0x32   :  { %v54_v13 = vrot.slane %v47_v11, %v53_v10 }
  0x34   :  { %v56_v14 = vadd.f32 %v54_v13, %v36_v12 }
  0x36   :  { %57 = vst [vmem:[#allocation7] sm:$0xf] %v56_v14 }
  0x37   :  { %133 = shalt.err (!%p130_p8)
}
  0x38   :  { %s134_s11 = scalar_lea.hbm %s217_s2, 64 }
  0x39   :  { %p135_p9 = scmp.ne.s32.totalorder %s217_s2, %s134_s11  ;;  %p138_p10 = scmp.lt.u32.totalorder %s134_s11, %s217_s2 }
  0x3b   :  { %p140_p11 = pnand %p138_p10, %p135_p9 }
  0x3d   :  { %143 = shalt.err (!%p140_p11)
}
  0x3e   :  { %67 = dma.vmem_to_hbm [thread:$0]  %s65_s8, 64, %s217_s2, [#allocation4]  }
  0x3f   :  { %148 = dma.done.wait [#allocation4], 64  }
  0x40   :  { %149 = vsyncadd [#allocation4], 4294967232 }
  0x41   :  { %71 = vsyncpa [#allocation3], 1 }
  0x42   :  { %72 = vsyncpa [#allocation6], 1 }
  0x43   :  { %73 = vsyncpa [#allocation4], 1 }

</bundles_post_ra>
